<compile_context>
chip_gen: v6e
topology: v6e:2x2x1
jax: 0.10.0
libtpu: 0.0.40
codegen_flags: <defaults>
</compile_context>

<pallas_src>
import functools
import math

import jax
import jax.numpy as jnp
from jax import lax
from jax.experimental import pallas as pl
from jax.experimental.pallas import tpu as pltpu

CLAMP_MIN = 1e-4
LOG_CLAMP_MIN = math.log(CLAMP_MIN)


def _round_up(x, m):
    return (x + m - 1) // m * m


def _sl_loss_tile_kernel(outputs_ref, targets_ref, mask_ref, partial_ref, *, n_total):
    # Widen after load; HBM traffic stays at native width (bf16 or f32).
    x = outputs_ref[...].astype(jnp.float32)     # (C, TILE_N)  classes on sublanes
    t = targets_ref[...]                         # (1, TILE_N)  int32 class ids
    m = mask_ref[...]                            # (1, TILE_N)  float32 mask

    c, tn = x.shape

    # Stable softmax pieces: reductions are over the 12-row sublane axis (cheap),
    # lanes (samples) stay independent.
    xmax = jnp.max(x, axis=0, keepdims=True)                       # (1, TILE_N)
    e = jnp.exp(x - xmax)                                          # (C, TILE_N)
    denom = jnp.sum(e, axis=0, keepdims=True)                      # (1, TILE_N)

    # Only the target-class probability is needed:
    #   sum_j log(clamped_onehot_j) * p_j = log(1e-4) * (1 - p_target)
    row = lax.broadcasted_iota(jnp.int32, (c, tn), 0)
    e_t = jnp.sum(jnp.where(row == t, e, 0.0), axis=0, keepdims=True)
    # approx=True would need a Newton step to hold tight tolerance; keep exact.
    p_t = e_t * pl.reciprocal(denom, approx=False)                 # (1, TILE_N)

    # Ragged-tail mask: lanes of the last grid step beyond n_total contain
    # unspecified data; use a select (not a multiply) so NaN/Inf there cannot
    # propagate as NaN*0.
    lane = pl.program_id(0) * tn + lax.broadcasted_iota(jnp.int32, (1, tn), 1)
    per_sample = jnp.where(lane < n_total, (1.0 - p_t) * m, 0.0)   # (1, TILE_N)

    tile_sum = jnp.sum(per_sample) * jnp.float32(LOG_CLAMP_MIN)

    # Lane-dense splat: full (8,128) vreg stores; the wrapper does one
    # contiguous full-bandwidth reduce and divides by 1024.
    partial_ref[...] = jnp.full(partial_ref.shape, tile_sum, dtype=jnp.float32)


def sl_loss_masked(outputs, targets, mask, beta=1.0, ind=None, tile_n=8192):
    """Pallas port of SL_loss_masked.forward (`ind` is unused, as in the PyTorch code).

    outputs: (N, C) logits, any float dtype (bf16 / f32)
    targets: (N,)   integer class ids
    mask:    (N,)   bool / int / float mask
    """
    del ind  # unused in the reference forward
    n, c = outputs.shape

    # Samples -> lane axis.
    # TODO(synk): have the producer emit (C, N) directly / fuse the loss so the
    # logits never round-trip HBM in (N, C) layout.
    outputs_t = jnp.transpose(outputs)                       # (C, N)
    targets2d = targets.astype(jnp.int32).reshape(1, n)      # (1, N)
    mask2d = mask.astype(jnp.float32).reshape(1, n)          # (1, N)

    if n < 128:
        # Full-extent lane block (block dim == array dim), single grid step.
        tile = n
    else:
        # Multiple of 128; at most tile_n; at least 2 tiles when N allows it so
        # v7x's second TensorCore gets work.  VMEM per logits buffer is
        # ~16 * tile * 4 B (512 KiB at tile=8192 f32) -> fine on v5e/v6e/v7x.
        tile = max(128, min(_round_up(tile_n, 128), _round_up(-(-n // 2), 128)))
    num_tiles = pl.cdiv(n, tile)

    kernel = functools.partial(_sl_loss_tile_kernel, n_total=n)

    partials = pl.pallas_call(
        kernel,
        out_shape=jax.ShapeDtypeStruct((num_tiles, 8, 128), jnp.float32),
        grid=(num_tiles,),
        in_specs=[
            pl.BlockSpec((c, tile), lambda i: (0, i)),
            pl.BlockSpec((1, tile), lambda i: (0, i)),
            pl.BlockSpec((1, tile), lambda i: (0, i)),
        ],
        out_specs=pl.BlockSpec((1, 8, 128), lambda i: (i, 0, 0)),
        compiler_params=pltpu.CompilerParams(
            # Independent per-tile partials -> shardable across v7x's 2 TCs.
            dimension_semantics=("parallel",),
        ),
    )(outputs_t, targets2d, mask2d)

    # Finalize: contiguous full-bandwidth reduce over the splatted partials
    # (all 1024 entries of a tile are identical), then mean and -beta scaling.
    total = jnp.sum(partials) * jnp.float32(1.0 / 1024.0)
    return -(jnp.float32(beta) / jnp.float32(n)) * total


def _reference(outputs, targets, mask, beta=1.0, class_num=12):
    onehot = jax.nn.one_hot(targets, class_num, dtype=jnp.float32)
    onehot = jnp.clip(onehot, CLAMP_MIN, 1.0)
    pred = jax.nn.softmax(outputs.astype(jnp.float32), axis=1)
    per = jnp.sum(jnp.log(onehot) * pred, axis=1) * mask.astype(jnp.float32)
    return -jnp.mean(per) * beta


if __name__ == "__main__":
    key = jax.random.PRNGKey(0)
    k1, k2, k3 = jax.random.split(key, 3)

    # Small case matching the module default (cls=12): single sub-128 block.
    N, C = 8, 12
    outputs = jax.random.normal(k1, (N, C), dtype=jnp.float32)
    targets = jax.random.randint(k2, (N,), 0, C, dtype=jnp.int32)
    mask = (jax.random.uniform(k3, (N,)) > 0.3).astype(jnp.float32)

    loss = sl_loss_masked(outputs, targets, mask, beta=1.0)
    jax.block_until_ready(loss)
    ref = _reference(outputs, targets, mask, beta=1.0, class_num=C)
    assert jnp.allclose(loss, ref, rtol=1e-5, atol=1e-5), (loss, ref)

    # Multi-tile / ragged-tail / bf16-input path (2 grid steps, tail of 44 rows).
    N2 = 300
    k4, k5, k6 = jax.random.split(jax.random.PRNGKey(1), 3)
    out2 = jax.random.normal(k4, (N2, C), dtype=jnp.float32).astype(jnp.bfloat16)
    tgt2 = jax.random.randint(k5, (N2,), 0, C, dtype=jnp.int32)
    msk2 = (jax.random.uniform(k6, (N2,)) > 0.5).astype(jnp.float32)
    loss2 = sl_loss_masked(out2, tgt2, msk2, beta=0.5, tile_n=256)
    jax.block_until_ready(loss2)
    ref2 = _reference(out2, tgt2, msk2, beta=0.5, class_num=C)
    assert jnp.allclose(loss2, ref2, rtol=1e-4, atol=1e-4), (loss2, ref2)

    print("KERNEL_OK")
</pallas_src>

<mosaic_0001>
module attributes {stable_mosaic.version = 11 : i64} {
  func.func @_sl_loss_tile_kernel(%arg0: i32, %arg1: memref<12x8xf32, #tpu.memory_space<vmem>>, %arg2: memref<1x8xi32, #tpu.memory_space<vmem>>, %arg3: memref<1x8xf32, #tpu.memory_space<vmem>>, %arg4: memref<1x8x128xf32, #tpu.memory_space<vmem>>) attributes {dimension_semantics = [#tpu.dimension_semantics<parallel>], iteration_bounds = array<i64: 1>, scalar_prefetch = 0 : i64, scratch_operands = 0 : i64, tpu.core_type = #tpu.core_type<tc>, window_params = [{transform_indices = @transform_0, window_bounds = array<i64: 12, 8>}, {transform_indices = @transform_1, window_bounds = array<i64: 1, 8>}, {transform_indices = @transform_2, window_bounds = array<i64: 1, 8>}, {transform_indices = @transform_3, window_bounds = array<i64: 1, 8, 128>}]} {
    %c0 = arith.constant 0 : index
    %c0_0 = arith.constant 0 : index
    %0 = vector.load %arg1[%c0, %c0_0] : memref<12x8xf32, #tpu.memory_space<vmem>>, vector<12x8xf32>
    %c0_1 = arith.constant 0 : index
    %c0_2 = arith.constant 0 : index
    %1 = vector.load %arg2[%c0_1, %c0_2] : memref<1x8xi32, #tpu.memory_space<vmem>>, vector<1x8xi32>
    %c0_3 = arith.constant 0 : index
    %c0_4 = arith.constant 0 : index
    %2 = vector.load %arg3[%c0_3, %c0_4] : memref<1x8xf32, #tpu.memory_space<vmem>>, vector<1x8xf32>
    %cst = arith.constant dense<0xFF800000> : vector<8xf32>
    %3 = vector.multi_reduction <maximumf>, %0, %cst [0] : vector<12x8xf32> to vector<8xf32>
    %4 = vector.shape_cast %3 : vector<8xf32> to vector<1x8xf32>
    %5 = vector.broadcast %4 : vector<1x8xf32> to vector<12x8xf32>
    %6 = arith.subf %0, %5 : vector<12x8xf32>
    %7 = math.exp %6 : vector<12x8xf32>
    %cst_5 = arith.constant dense<0.000000e+00> : vector<8xf32>
    %8 = vector.multi_reduction <add>, %7, %cst_5 [0] : vector<12x8xf32> to vector<8xf32>
    %9 = vector.shape_cast %8 : vector<8xf32> to vector<1x8xf32>
    %10 = tpu.iota {dimensions = array<i32: 0>} : vector<12x8xi32>
    %11 = vector.broadcast %1 : vector<1x8xi32> to vector<12x8xi32>
    %12 = arith.cmpi eq, %10, %11 : vector<12x8xi32>
    %cst_6 = arith.constant 0.000000e+00 : f32
    %13 = vector.broadcast %cst_6 : f32 to vector<12x8xf32>
    %14 = arith.select %12, %7, %13 : vector<12x8xi1>, vector<12x8xf32>
    %cst_7 = arith.constant dense<0.000000e+00> : vector<8xf32>
    %15 = vector.multi_reduction <add>, %14, %cst_7 [0] : vector<12x8xf32> to vector<8xf32>
    %16 = vector.shape_cast %15 : vector<8xf32> to vector<1x8xf32>
    %17 = tpu.reciprocal %9 : vector<1x8xf32> -> vector<1x8xf32>
    %18 = arith.mulf %16, %17 : vector<1x8xf32>
    %c8_i32 = arith.constant 8 : i32
    %19 = arith.muli %arg0, %c8_i32 : i32
    %20 = tpu.iota {dimensions = array<i32: 1>} : vector<1x8xi32>
    %21 = vector.broadcast %19 : i32 to vector<1x8xi32>
    %22 = arith.addi %21, %20 : vector<1x8xi32>
    %c8_i32_8 = arith.constant 8 : i32
    %23 = vector.broadcast %c8_i32_8 : i32 to vector<1x8xi32>
    %24 = arith.cmpi slt, %22, %23 : vector<1x8xi32>
    %cst_9 = arith.constant 1.000000e+00 : f32
    %25 = vector.broadcast %cst_9 : f32 to vector<1x8xf32>
    %26 = arith.subf %25, %18 : vector<1x8xf32>
    %27 = arith.mulf %26, %2 : vector<1x8xf32>
    %cst_10 = arith.constant 0.000000e+00 : f32
    %28 = vector.broadcast %cst_10 : f32 to vector<1x8xf32>
    %29 = arith.select %24, %27, %28 : vector<1x8xi1>, vector<1x8xf32>
    %30 = vector.shape_cast %29 : vector<1x8xf32> to vector<1x1x8xf32>
    %cst_11 = arith.constant dense<0.000000e+00> : vector<1xf32>
    %31 = vector.multi_reduction <add>, %30, %cst_11 [1, 2] : vector<1x1x8xf32> to vector<1xf32>
    %32 = vector.shape_cast %31 : vector<1xf32> to vector<1x1x1xf32>
    %33 = vector.extract %32[0, 0, 0] : f32 from vector<1x1x1xf32>
    %cst_12 = arith.constant -9.21034049 : f32
    %34 = arith.mulf %33, %cst_12 : f32
    %35 = vector.broadcast %34 : f32 to vector<1x8x128xf32>
    %c0_13 = arith.constant 0 : index
    %c0_14 = arith.constant 0 : index
    %c0_15 = arith.constant 0 : index
    %36 = vector.load %arg4[%c0_13, %c0_14, %c0_15] : memref<1x8x128xf32, #tpu.memory_space<vmem>>, vector<1x8x128xf32>
    tpu.vector_store %arg4[%c0_13, %c0_14, %c0_15], %35 {strides = array<i32>} : memref<1x8x128xf32, #tpu.memory_space<vmem>>, vector<1x8x128xf32>,
    return
  }
  func.func @transform_0(%arg0: i32) -> (i32, i32) {
    %c0_i32 = arith.constant 0 : i32
    %c0_i32_0 = arith.constant 0 : i32
    return %c0_i32, %arg0 : i32, i32
  }
  func.func @transform_1(%arg0: i32) -> (i32, i32) {
    %c0_i32 = arith.constant 0 : i32
    %c0_i32_0 = arith.constant 0 : i32
    return %c0_i32, %arg0 : i32, i32
  }
  func.func @transform_2(%arg0: i32) -> (i32, i32) {
    %c0_i32 = arith.constant 0 : i32
    %c0_i32_0 = arith.constant 0 : i32
    return %c0_i32, %arg0 : i32, i32
  }
  func.func @transform_3(%arg0: i32) -> (i32, i32, i32) {
    %c0_i32 = arith.constant 0 : i32
    %c0_i32_0 = arith.constant 0 : i32
    %c0_i32_1 = arith.constant 0 : i32
    return %arg0, %c0_i32, %c0_i32_0 : i32, i32, i32
  }
}

</mosaic_0001>

<bundles_post_ra>
// kernel: tpu_custom_call.1
= control target key start
LH: loop header
LB: loop body
LE: loop exit
PB: predicated region body
PF: predicated region fallthrough
CT: control target
= control target key end

     0   :  { %vm19_vm0 = vcmask 64512   ;;  %vm21_vm1 = vcmask 60416   ;;  %s178_s0 = inlined_call_operand.vmem [shape: f32[12,8], index: 0, kind: input, shape index: {}]   ;;  %s179_s1 = inlined_call_operand.vmem [shape: s32[1,8], index: 1, kind: input, shape index: {}]   ;;  %s180_s2 = inlined_call_operand.vmem [shape: f32[1,8], index: 2, kind: input, shape index: {}]   ;;  %s181_s3 = inlined_call_operand.hbm [shape: f32[1,8,128], index: 3, kind: output, shape index: {}]  }
   0x1   :  { %v15_v0 = vld [vmem:[%s178_s0] sm:$0xff]  ;;  %v16_v1 = vld [vmem:[%s178_s0 + $0x8] sm:$0xf] }
   0x2   :  { %v20_v2 = vsel %vm19_vm0, %v15_v0, -inf  ;;  %v22_v3 = vsel %vm21_vm1, %v16_v1, -inf }
   0x3   :  { %8 = vsyncpa [#allocation3], 0  ;;  %v23_v4 = vmax.f32 %v20_v2, %v22_v3  ;;  %v45_v15 = vlaneseq  ;;  %v104_v17 = vld [vmem:[%s179_s1] ss:$0 sm:$0xff]  ;;  %vm76_vm5 = vcmask 57344   ;;  %s136_s18 = smov [#allocation2]  }
   0x4   :  { %v18_v44 = vld [vmem:[%s180_s2] sm:$0x1]  ;;  %s96_s19 = sshll.u32 %s136_s18, 4  ;;  %s97_s19 = int_to_ptr.vmem [resolvable:$true] %s96_s19 }
   0x5   :  { %v24_v5 = vrot.slane %v23_v4, 4  ;;  %v46_v16 = vshrl.u32 %v45_v15, 7  ;;  %v69_v42 = vand.u32 127, %v45_v15  ;;  %s114_s2 = scalar_lea.vmem %s97_s19, 128  ;;  %p119_p1 = scmp.lt.s32.totalorder %s97_s19, %s97_s19 }
   0x6   :  { %p115_p0 = scmp.ne.s32.totalorder %s97_s19, %s114_s2  ;;  %p120_p2 = scmp.lt.s32.totalorder %s114_s2, %s114_s2 }
   0x7   :  { %v25_v6 = vmax.f32 %v23_v4, %v24_v5  ;;  %v47_v18 = vadd.s32 8, %v46_v16  ;;  %vm52_vm2 = vcmp.eq.s32.totalorder %v46_v16, %v104_v17  ;;  %vm72_vm4 = vcmp.lt.s32.totalorder %v69_v42, 8 }
   0x8   :  { %p121_p3 = por %p120_p2, %p119_p1 }
   0x9   :  { %v26_v7 = vrot.slane %v25_v6, 2  ;;  %vm53_vm3 = vcmp.eq.s32.totalorder %v47_v18, %v104_v17 }
   0xa   :  { %p122_p4 = pnand %p121_p3, %p115_p0 }
   0xb   :  { %v27_v8 = vmax.f32 %v25_v6, %v26_v7 }
   0xd   :  { %v28_v9 = vrot.slane %v27_v8, 1 }
   0xf   :  { %v29_v10 = vmax.f32 %v27_v8, %v28_v9 }
  0x11   :  { %v30_v11 = vsub.f32 %v15_v0, %v29_v10  ;;  %v31_v12 = vsub.f32 %v16_v1, %v29_v10 }
  0x13   :  { %v32_v13 = vmul.f32 1.442695, %v30_v11  ;;  %v34_v14 = vmul.f32 1.442695, %v31_v12 }
  0x15   :  { %108 = vpow2.f32 %v32_v13 }
  0x16   :  { %110 = vpow2.f32 %v34_v14 }
  0x22   :  { %v109_v19 = vpop.eup %108 }
  0x23   :  { %v111_v20 = vpop.eup %110  ;;  %v36_v21 = vsel %vm19_vm0, %v109_v19, 0.0  ;;  %v54_v22 = vsel %vm52_vm2, %v109_v19, 0.0 }
  0x24   :  { %v37_v23 = vsel %vm21_vm1, %v111_v20, 0.0  ;;  %v55_v24 = vsel %vm53_vm3, %v111_v20, 0.0  ;;  %v56_v25 = vsel %vm19_vm0, %v54_v22, 0.0 }
  0x25   :  { %v38_v26 = vadd.f32 %v37_v23, %v36_v21  ;;  %v57_v27 = vsel %vm21_vm1, %v55_v24, 0.0 }
  0x26   :  { %v58_v28 = vadd.f32 %v57_v27, %v56_v25 }
  0x27   :  { %v39_v29 = vrot.slane %v38_v26, 4 }
  0x28   :  { %v59_v31 = vrot.slane %v58_v28, 4 }
  0x29   :  { %v40_v30 = vadd.f32 %v39_v29, %v38_v26 }
  0x2a   :  { %v60_v34 = vadd.f32 %v59_v31, %v58_v28 }
  0x2b   :  { %v41_v32 = vrot.slane %v40_v30, 2 }
  0x2c   :  { %v61_v37 = vrot.slane %v60_v34, 2 }
  0x2d   :  { %v42_v33 = vadd.f32 %v41_v32, %v40_v30 }
  0x2e   :  { %v62_v38 = vadd.f32 %v61_v37, %v60_v34 }
  0x2f   :  { %v43_v35 = vrot.slane %v42_v33, 1 }
  0x30   :  { %v63_v39 = vrot.slane %v62_v38, 1 }
  0x31   :  { %v44_v36 = vadd.f32 %v43_v35, %v42_v33 }
  0x32   :  { %v64_v40 = vadd.f32 %v63_v39, %v62_v38 }
  0x33   :  { %112 = vrcp.f32 %v44_v36 }
  0x40   :  { %v113_v41 = vpop.eup %112 }
  0x41   :  { %v66_v43 = vmul.f32 %v113_v41, %v64_v40 }
  0x43   :  { %v73_v45 = vsub.f32 1.0, %v66_v43 }
  0x45   :  { %v74_v46 = vmul.f32 %v73_v45, %v18_v44 }
  0x47   :  { %v75_v47 = vsel %vm72_vm4, %v74_v46, 0.0 }
  0x48   :  { %v77_v48 = vsel %vm76_vm5, %v75_v47, 0.0 }
  0x49   :  { %78 = vadd.xlane.f32.xlu0 %v77_v48 }
  0xd2   :  { %v79_v49 = vpop.xlane.xlu0 %78 }
  0xd3   :  { %v80_v50 = vrot.slane %v79_v49, 4 }
  0xd5   :  { %v81_v51 = vadd.f32 %v80_v50, %v79_v49 }
  0xd7   :  { %v82_v52 = vrot.slane %v81_v51, 2 }
  0xd9   :  { %v83_v53 = vadd.f32 %v82_v52, %v81_v51 }
  0xdb   :  { %v84_v54 = vrot.slane %v83_v53, 1 }
  0xdd   :  { %v85_v55 = vadd.f32 %v84_v54, %v83_v53 }
  0xdf   :  { %105 = vpush %v85_v55 }
 0x110   :  { %s106_s20 = spop %105 }
 0x111   :  { %s87_s21 = smul.f32 -9.2103405, %s106_s20 }
 0x113   :  { %v88_v56 = vstv %s87_s21 }
 0x114   :  { %89 = vst [vmem:[#allocation2] sm:$0xff] %v88_v56 }
 0x115   :  { %125 = shalt.err (!%p122_p4)
}
 0x116   :  { %99 = dma.vmem_to_hbm [thread:$0]  %s97_s19, 128, %s181_s3, [#allocation3]  }
 0x117   :  { %134 = dma.done.wait [#allocation3], 128  }
 0x118   :  { %135 = vsyncadd [#allocation3], 4294967168 }
 0x119   :  { %103 = vsyncpa [#allocation3], 1 }

</bundles_post_ra>
